<compile_context>
chip_gen: v5e
topology: v5e:2x2
jax: 0.10.0
libtpu: 0.0.40
codegen_flags: <defaults>
</compile_context>

<pallas_src>
import functools

import jax
import jax.numpy as jnp
from jax import lax
from jax.experimental import pallas as pl
from jax.experimental.pallas import tpu as pltpu

NEG_INF = -9e15          # same "masked edge" constant as the reference
LEAKY_SLOPE = 0.2        # standard GAT LeakyReLU negative slope
_NT_DIMS = (((1,), (1,)), ((), ()))   # contract last dims: [1,F] x [N,F] -> [1,N]


def _user_gat_kernel(e_ref, a_ref,
                     w1_ref, ws1_ref, wd1_ref,
                     w2_ref, ws2_ref, wd2_ref,
                     drop_ref, o_ref, *, approx_recip):
    """Fused gat1 -> ReLU -> dropout -> gat2 -> ReLU for one small graph."""
    A = a_ref[...]

    def gat_block(X, w_ref, wsrc_ref, wdst_ref):
        # Feature projection + folded attention projections (all MXU work).
        h = jnp.dot(X, w_ref[...], preferred_element_type=jnp.float32)          # [N,Fo]
        f_src = jnp.dot(X, wsrc_ref[...], preferred_element_type=jnp.float32)   # [N,1]
        f_dst = lax.dot_general(wdst_ref[...], X, _NT_DIMS,
                                preferred_element_type=jnp.float32)             # [1,N]

        # e_ij = LeakyReLU(f_src_i + f_dst_j), then mask to existing edges.
        s = f_src + f_dst                                                        # [N,N]
        s = jnp.where(s > 0, s, LEAKY_SLOPE * s)
        s = jnp.where(A > 0, s, jnp.float32(NEG_INF))

        # Row softmax over neighbours. NOTE: assumes every row of A has at
        # least one edge (driver adds self-loops), same invariant as reference.
        m = jnp.max(s, axis=1, keepdims=True)
        p = jnp.exp(s - m)
        denom = jnp.sum(p, axis=1, keepdims=True)
        attn = p * pl.reciprocal(denom, approx=approx_recip)

        out = jnp.dot(attn, h, preferred_element_type=jnp.float32)               # [N,Fo]
        return jnp.maximum(out, 0.0)                                             # F.relu

    x1 = gat_block(e_ref[...], w1_ref, ws1_ref, wd1_ref)
    x1 = x1 * drop_ref[...]          # inverted dropout; mask pre-scaled by 1/(1-p)
    x2 = gat_block(x1, w2_ref, ws2_ref, wd2_ref)
    o_ref[...] = x2.astype(o_ref.dtype)


def user_gat(E, A, params, dropout_key, drop_p=0.3):
    """UserGAT.forward: relu(gat1(E,A)) -> F.dropout(p=0.3) -> relu(gat2(., A))."""
    N, Fin = E.shape
    Fo1 = params["W1"].shape[1]
    Fo2 = params["W2"].shape[1]

    # Fold the attention vectors through W (tiny wrapper-side matmuls) so the
    # kernel computes attention logits purely with MXU matmuls.
    ws1 = params["W1"] @ params["a1_src"].T            # [Fin, 1]
    wd1 = (params["W1"] @ params["a1_dst"].T).T        # [1, Fin]
    ws2 = params["W2"] @ params["a2_src"].T            # [Fo1, 1]
    wd2 = (params["W2"] @ params["a2_dst"].T).T        # [1, Fo1]

    # TODO(synk): dropout RNG stream differs from torch (distribution and
    # 1/(1-p) scaling are identical). Mask is drawn with jax.random because
    # pltpu.prng_* has no interpret/CPU lowering.
    keep = jax.random.bernoulli(dropout_key, 1.0 - drop_p, (N, Fo1))
    drop_mask = keep.astype(jnp.float32) * (1.0 / (1.0 - drop_p))

    def full(shape):
        return pl.BlockSpec(shape, lambda i: (0, 0))

    kernel = functools.partial(
        _user_gat_kernel,
        # approx=True lowers the softmax reciprocal to the (otherwise idle) EUP
        # on real TPUs; keep the exact path on non-TPU / interpret backends.
        approx_recip=(jax.default_backend() == "tpu"),
    )

    return pl.pallas_call(
        kernel,
        grid=(1,),
        in_specs=[
            full((N, Fin)),     # E
            full((N, N)),       # A
            full((Fin, Fo1)),   # W1
            full((Fin, 1)),     # W1 @ a1_src^T       (src projection, column)
            full((1, Fin)),     # (W1 @ a1_dst^T)^T   (dst projection, row)
            full((Fo1, Fo2)),   # W2
            full((Fo1, 1)),     # W2 @ a2_src^T
            full((1, Fo1)),     # (W2 @ a2_dst^T)^T
            full((N, Fo1)),     # dropout keep-mask (pre-scaled)
        ],
        out_specs=full((N, Fo2)),
        out_shape=jax.ShapeDtypeStruct((N, Fo2), jnp.float32),
        compiler_params=pltpu.CompilerParams(
            dimension_semantics=("arbitrary",)),
    )(E, A, params["W1"], ws1, wd1, params["W2"], ws2, wd2, drop_mask)


def init_params(key, out_dim, out_dim2):
    ks = jax.random.split(key, 6)

    def xavier(k, shape):
        fan_in, fan_out = shape[-2], shape[-1]
        lim = (6.0 / (fan_in + fan_out)) ** 0.5
        return jax.random.uniform(k, shape, jnp.float32, -lim, lim)

    return {
        "W1": xavier(ks[0], (out_dim, out_dim)),
        "a1_src": xavier(ks[1], (1, out_dim)),
        "a1_dst": xavier(ks[2], (1, out_dim)),
        "W2": xavier(ks[3], (out_dim, out_dim2)),
        "a2_src": xavier(ks[4], (1, out_dim2)),
        "a2_dst": xavier(ks[5], (1, out_dim2)),
    }


if __name__ == "__main__":
    out_dim, out_dim2 = 32, 16   # the module's (module-level) dims, chosen here
    N = 64                       # number of graph nodes (users)

    key = jax.random.PRNGKey(0)
    k_e, k_a, k_p, k_d = jax.random.split(key, 4)

    E = jax.random.normal(k_e, (N, out_dim), dtype=jnp.float32)
    A = (jax.random.uniform(k_a, (N, N)) < 0.2).astype(jnp.float32)
    A = jnp.maximum(A, jnp.eye(N, dtype=jnp.float32))   # self loops: no empty rows

    params = init_params(k_p, out_dim, out_dim2)
    out = user_gat(E, A, params, dropout_key=k_d)
    jax.block_until_ready(out)
    assert out.shape == (N, out_dim2) and out.dtype == jnp.float32
    print("KERNEL_OK")
</pallas_src>

<mosaic_0001>
module attributes {stable_mosaic.version = 11 : i64} {
  func.func @_user_gat_kernel(%arg0: i32, %arg1: memref<64x32xf32, #tpu.memory_space<vmem>>, %arg2: memref<64x64xf32, #tpu.memory_space<vmem>>, %arg3: memref<32x32xf32, #tpu.memory_space<vmem>>, %arg4: memref<32x1xf32, #tpu.memory_space<vmem>>, %arg5: memref<1x32xf32, #tpu.memory_space<vmem>>, %arg6: memref<32x16xf32, #tpu.memory_space<vmem>>, %arg7: memref<32x1xf32, #tpu.memory_space<vmem>>, %arg8: memref<1x32xf32, #tpu.memory_space<vmem>>, %arg9: memref<64x32xf32, #tpu.memory_space<vmem>>, %arg10: memref<64x16xf32, #tpu.memory_space<vmem>>) attributes {dimension_semantics = [#tpu.dimension_semantics<arbitrary>], iteration_bounds = array<i64: 1>, scalar_prefetch = 0 : i64, scratch_operands = 0 : i64, tpu.core_type = #tpu.core_type<tc>, window_params = [{pipeline_mode = #tpu.pipeline_mode<synchronous>, transform_indices = @transform_0, window_bounds = array<i64: 64, 32>}, {pipeline_mode = #tpu.pipeline_mode<synchronous>, transform_indices = @transform_1, window_bounds = array<i64: 64, 64>}, {pipeline_mode = #tpu.pipeline_mode<synchronous>, transform_indices = @transform_2, window_bounds = array<i64: 32, 32>}, {pipeline_mode = #tpu.pipeline_mode<synchronous>, transform_indices = @transform_3, window_bounds = array<i64: 32, 1>}, {pipeline_mode = #tpu.pipeline_mode<synchronous>, transform_indices = @transform_4, window_bounds = array<i64: 1, 32>}, {pipeline_mode = #tpu.pipeline_mode<synchronous>, transform_indices = @transform_5, window_bounds = array<i64: 32, 16>}, {pipeline_mode = #tpu.pipeline_mode<synchronous>, transform_indices = @transform_6, window_bounds = array<i64: 32, 1>}, {pipeline_mode = #tpu.pipeline_mode<synchronous>, transform_indices = @transform_7, window_bounds = array<i64: 1, 32>}, {pipeline_mode = #tpu.pipeline_mode<synchronous>, transform_indices = @transform_8, window_bounds = array<i64: 64, 32>}, {pipeline_mode = #tpu.pipeline_mode<synchronous>, transform_indices = @transform_9, window_bounds = array<i64: 64, 16>}]} {
    %c0 = arith.constant 0 : index
    %c0_0 = arith.constant 0 : index
    %0 = vector.load %arg2[%c0, %c0_0] : memref<64x64xf32, #tpu.memory_space<vmem>>, vector<64x64xf32>
    %c0_1 = arith.constant 0 : index
    %c0_2 = arith.constant 0 : index
    %1 = vector.load %arg1[%c0_1, %c0_2] : memref<64x32xf32, #tpu.memory_space<vmem>>, vector<64x32xf32>
    %c0_3 = arith.constant 0 : index
    %c0_4 = arith.constant 0 : index
    %2 = vector.load %arg3[%c0_3, %c0_4] : memref<32x32xf32, #tpu.memory_space<vmem>>, vector<32x32xf32>
    %cst = arith.constant dense<0.000000e+00> : vector<64x32xf32>
    %3 = tpu.matmul %1, %2, %cst {dimension_numbers = #tpu.dot_dimension_numbers<[1], [0], [0], [1], [0, 0, 1, 1], [], []>} : vector<64x32xf32>, vector<32x32xf32>, vector<64x32xf32> -> vector<64x32xf32>
    %c0_5 = arith.constant 0 : index
    %c0_6 = arith.constant 0 : index
    %4 = vector.load %arg4[%c0_5, %c0_6] : memref<32x1xf32, #tpu.memory_space<vmem>>, vector<32x1xf32>
    %cst_7 = arith.constant dense<0.000000e+00> : vector<64x1xf32>
    %5 = tpu.matmul %1, %4, %cst_7 {dimension_numbers = #tpu.dot_dimension_numbers<[1], [0], [0], [1], [0, 0, 1, 1], [], []>} : vector<64x32xf32>, vector<32x1xf32>, vector<64x1xf32> -> vector<64x1xf32>
    %c0_8 = arith.constant 0 : index
    %c0_9 = arith.constant 0 : index
    %6 = vector.load %arg5[%c0_8, %c0_9] : memref<1x32xf32, #tpu.memory_space<vmem>>, vector<1x32xf32>
    %cst_10 = arith.constant dense<0.000000e+00> : vector<1x64xf32>
    %7 = tpu.matmul %6, %1, %cst_10 {dimension_numbers = #tpu.dot_dimension_numbers<[1], [1], [0], [0], [0, 0, 1, 0], [], []>} : vector<1x32xf32>, vector<64x32xf32>, vector<1x64xf32> -> vector<1x64xf32>
    %8 = vector.broadcast %5 : vector<64x1xf32> to vector<64x64xf32>
    %9 = vector.broadcast %7 : vector<1x64xf32> to vector<64x64xf32>
    %10 = arith.addf %8, %9 : vector<64x64xf32>
    %cst_11 = arith.constant 0.000000e+00 : f32
    %11 = vector.broadcast %cst_11 : f32 to vector<64x64xf32>
    %12 = arith.cmpf ogt, %10, %11 : vector<64x64xf32>
    %cst_12 = arith.constant 2.000000e-01 : f32
    %13 = vector.broadcast %cst_12 : f32 to vector<64x64xf32>
    %14 = arith.mulf %13, %10 : vector<64x64xf32>
    %15 = arith.select %12, %10, %14 : vector<64x64xi1>, vector<64x64xf32>
    %cst_13 = arith.constant 0.000000e+00 : f32
    %16 = vector.broadcast %cst_13 : f32 to vector<64x64xf32>
    %17 = arith.cmpf ogt, %0, %16 : vector<64x64xf32>
    %cst_14 = arith.constant -9.000000e+15 : f32
    %18 = vector.broadcast %cst_14 : f32 to vector<64x64xf32>
    %19 = arith.select %17, %15, %18 : vector<64x64xi1>, vector<64x64xf32>
    %cst_15 = arith.constant dense<0xFF800000> : vector<64xf32>
    %20 = vector.multi_reduction <maximumf>, %19, %cst_15 [1] : vector<64x64xf32> to vector<64xf32>
    %21 = vector.shape_cast %20 : vector<64xf32> to vector<64x1xf32>
    %22 = vector.broadcast %21 : vector<64x1xf32> to vector<64x64xf32>
    %23 = arith.subf %19, %22 : vector<64x64xf32>
    %24 = math.exp %23 : vector<64x64xf32>
    %cst_16 = arith.constant dense<0.000000e+00> : vector<64xf32>
    %25 = vector.multi_reduction <add>, %24, %cst_16 [1] : vector<64x64xf32> to vector<64xf32>
    %26 = vector.shape_cast %25 : vector<64xf32> to vector<64x1xf32>
    %27 = tpu.reciprocal %26 : vector<64x1xf32> -> vector<64x1xf32>
    %28 = vector.broadcast %27 : vector<64x1xf32> to vector<64x64xf32>
    %29 = arith.mulf %24, %28 : vector<64x64xf32>
    %cst_17 = arith.constant dense<0.000000e+00> : vector<64x32xf32>
    %30 = tpu.matmul %29, %3, %cst_17 {dimension_numbers = #tpu.dot_dimension_numbers<[1], [0], [0], [1], [0, 0, 1, 1], [], []>} : vector<64x64xf32>, vector<64x32xf32>, vector<64x32xf32> -> vector<64x32xf32>
    %cst_18 = arith.constant 0.000000e+00 : f32
    %31 = vector.broadcast %cst_18 : f32 to vector<64x32xf32>
    %32 = arith.maximumf %30, %31 : vector<64x32xf32>
    %c0_19 = arith.constant 0 : index
    %c0_20 = arith.constant 0 : index
    %33 = vector.load %arg9[%c0_19, %c0_20] : memref<64x32xf32, #tpu.memory_space<vmem>>, vector<64x32xf32>
    %34 = arith.mulf %32, %33 : vector<64x32xf32>
    %c0_21 = arith.constant 0 : index
    %c0_22 = arith.constant 0 : index
    %35 = vector.load %arg6[%c0_21, %c0_22] : memref<32x16xf32, #tpu.memory_space<vmem>>, vector<32x16xf32>
    %cst_23 = arith.constant dense<0.000000e+00> : vector<64x16xf32>
    %36 = tpu.matmul %34, %35, %cst_23 {dimension_numbers = #tpu.dot_dimension_numbers<[1], [0], [0], [1], [0, 0, 1, 1], [], []>} : vector<64x32xf32>, vector<32x16xf32>, vector<64x16xf32> -> vector<64x16xf32>
    %c0_24 = arith.constant 0 : index
    %c0_25 = arith.constant 0 : index
    %37 = vector.load %arg7[%c0_24, %c0_25] : memref<32x1xf32, #tpu.memory_space<vmem>>, vector<32x1xf32>
    %cst_26 = arith.constant dense<0.000000e+00> : vector<64x1xf32>
    %38 = tpu.matmul %34, %37, %cst_26 {dimension_numbers = #tpu.dot_dimension_numbers<[1], [0], [0], [1], [0, 0, 1, 1], [], []>} : vector<64x32xf32>, vector<32x1xf32>, vector<64x1xf32> -> vector<64x1xf32>
    %c0_27 = arith.constant 0 : index
    %c0_28 = arith.constant 0 : index
    %39 = vector.load %arg8[%c0_27, %c0_28] : memref<1x32xf32, #tpu.memory_space<vmem>>, vector<1x32xf32>
    %cst_29 = arith.constant dense<0.000000e+00> : vector<1x64xf32>
    %40 = tpu.matmul %39, %34, %cst_29 {dimension_numbers = #tpu.dot_dimension_numbers<[1], [1], [0], [0], [0, 0, 1, 0], [], []>} : vector<1x32xf32>, vector<64x32xf32>, vector<1x64xf32> -> vector<1x64xf32>
    %41 = vector.broadcast %38 : vector<64x1xf32> to vector<64x64xf32>
    %42 = vector.broadcast %40 : vector<1x64xf32> to vector<64x64xf32>
    %43 = arith.addf %41, %42 : vector<64x64xf32>
    %cst_30 = arith.constant 0.000000e+00 : f32
    %44 = vector.broadcast %cst_30 : f32 to vector<64x64xf32>
    %45 = arith.cmpf ogt, %43, %44 : vector<64x64xf32>
    %cst_31 = arith.constant 2.000000e-01 : f32
    %46 = vector.broadcast %cst_31 : f32 to vector<64x64xf32>
    %47 = arith.mulf %46, %43 : vector<64x64xf32>
    %48 = arith.select %45, %43, %47 : vector<64x64xi1>, vector<64x64xf32>
    %cst_32 = arith.constant 0.000000e+00 : f32
    %49 = vector.broadcast %cst_32 : f32 to vector<64x64xf32>
    %50 = arith.cmpf ogt, %0, %49 : vector<64x64xf32>
    %cst_33 = arith.constant -9.000000e+15 : f32
    %51 = vector.broadcast %cst_33 : f32 to vector<64x64xf32>
    %52 = arith.select %50, %48, %51 : vector<64x64xi1>, vector<64x64xf32>
    %cst_34 = arith.constant dense<0xFF800000> : vector<64xf32>
    %53 = vector.multi_reduction <maximumf>, %52, %cst_34 [1] : vector<64x64xf32> to vector<64xf32>
    %54 = vector.shape_cast %53 : vector<64xf32> to vector<64x1xf32>
    %55 = vector.broadcast %54 : vector<64x1xf32> to vector<64x64xf32>
    %56 = arith.subf %52, %55 : vector<64x64xf32>
    %57 = math.exp %56 : vector<64x64xf32>
    %cst_35 = arith.constant dense<0.000000e+00> : vector<64xf32>
    %58 = vector.multi_reduction <add>, %57, %cst_35 [1] : vector<64x64xf32> to vector<64xf32>
    %59 = vector.shape_cast %58 : vector<64xf32> to vector<64x1xf32>
    %60 = tpu.reciprocal %59 : vector<64x1xf32> -> vector<64x1xf32>
    %61 = vector.broadcast %60 : vector<64x1xf32> to vector<64x64xf32>
    %62 = arith.mulf %57, %61 : vector<64x64xf32>
    %cst_36 = arith.constant dense<0.000000e+00> : vector<64x16xf32>
    %63 = tpu.matmul %62, %36, %cst_36 {dimension_numbers = #tpu.dot_dimension_numbers<[1], [0], [0], [1], [0, 0, 1, 1], [], []>} : vector<64x64xf32>, vector<64x16xf32>, vector<64x16xf32> -> vector<64x16xf32>
    %cst_37 = arith.constant 0.000000e+00 : f32
    %64 = vector.broadcast %cst_37 : f32 to vector<64x16xf32>
    %65 = arith.maximumf %63, %64 : vector<64x16xf32>
    %c0_38 = arith.constant 0 : index
    %c0_39 = arith.constant 0 : index
    %66 = vector.load %arg10[%c0_38, %c0_39] : memref<64x16xf32, #tpu.memory_space<vmem>>, vector<64x16xf32>
    tpu.vector_store %arg10[%c0_38, %c0_39], %65 {strides = array<i32>} : memref<64x16xf32, #tpu.memory_space<vmem>>, vector<64x16xf32>,
    return
  }
  func.func @transform_0(%arg0: i32) -> (i32, i32) {
    %c0_i32 = arith.constant 0 : i32
    %c0_i32_0 = arith.constant 0 : i32
    %c0_i32_1 = arith.constant 0 : i32
    return %c0_i32, %c0_i32_0 : i32, i32
  }
  func.func @transform_1(%arg0: i32) -> (i32, i32) {
    %c0_i32 = arith.constant 0 : i32
    %c0_i32_0 = arith.constant 0 : i32
    %c0_i32_1 = arith.constant 0 : i32
    return %c0_i32, %c0_i32_0 : i32, i32
  }
  func.func @transform_2(%arg0: i32) -> (i32, i32) {
    %c0_i32 = arith.constant 0 : i32
    %c0_i32_0 = arith.constant 0 : i32
    %c0_i32_1 = arith.constant 0 : i32
    return %c0_i32, %c0_i32_0 : i32, i32
  }
  func.func @transform_3(%arg0: i32) -> (i32, i32) {
    %c0_i32 = arith.constant 0 : i32
    %c0_i32_0 = arith.constant 0 : i32
    %c0_i32_1 = arith.constant 0 : i32
    return %c0_i32, %c0_i32_0 : i32, i32
  }
  func.func @transform_4(%arg0: i32) -> (i32, i32) {
    %c0_i32 = arith.constant 0 : i32
    %c0_i32_0 = arith.constant 0 : i32
    %c0_i32_1 = arith.constant 0 : i32
    return %c0_i32, %c0_i32_0 : i32, i32
  }
  func.func @transform_5(%arg0: i32) -> (i32, i32) {
    %c0_i32 = arith.constant 0 : i32
    %c0_i32_0 = arith.constant 0 : i32
    %c0_i32_1 = arith.constant 0 : i32
    return %c0_i32, %c0_i32_0 : i32, i32
  }
  func.func @transform_6(%arg0: i32) -> (i32, i32) {
    %c0_i32 = arith.constant 0 : i32
    %c0_i32_0 = arith.constant 0 : i32
    %c0_i32_1 = arith.constant 0 : i32
    return %c0_i32, %c0_i32_0 : i32, i32
  }
  func.func @transform_7(%arg0: i32) -> (i32, i32) {
    %c0_i32 = arith.constant 0 : i32
    %c0_i32_0 = arith.constant 0 : i32
    %c0_i32_1 = arith.constant 0 : i32
    return %c0_i32, %c0_i32_0 : i32, i32
  }
  func.func @transform_8(%arg0: i32) -> (i32, i32) {
    %c0_i32 = arith.constant 0 : i32
    %c0_i32_0 = arith.constant 0 : i32
    %c0_i32_1 = arith.constant 0 : i32
    return %c0_i32, %c0_i32_0 : i32, i32
  }
  func.func @transform_9(%arg0: i32) -> (i32, i32) {
    %c0_i32 = arith.constant 0 : i32
    %c0_i32_0 = arith.constant 0 : i32
    %c0_i32_1 = arith.constant 0 : i32
    return %c0_i32, %c0_i32_0 : i32, i32
  }
}

</mosaic_0001>

<bundles_post_ra>
// kernel: tpu_custom_call.1
= control target key start
LH: loop header
LB: loop body
LE: loop exit
PB: predicated region body
PF: predicated region fallthrough
CT: control target
= control target key end

     0   :  { %vm52_vm0 = vcmask 261120   ;;  %v1201_v11 = vmov 0   ;;  %vm276_vm3 = vcmask 523264   ;;  %s1720_s3 = inlined_call_operand.vmem [shape: f32[32,1], index: 3, kind: input, shape index: {}]   ;;  %s1721_s0 = inlined_call_operand.vmem [shape: f32[64,32], index: 0, kind: input, shape index: {}]   ;;  %s1722_s4 = inlined_call_operand.vmem [shape: f32[1,32], index: 4, kind: input, shape index: {}]   ;;  %s1723_s2 = inlined_call_operand.vmem [shape: f32[32,32], index: 2, kind: input, shape index: {}]   ;;  %s1724_s1 = inlined_call_operand.vmem [shape: f32[64,64], index: 1, kind: input, shape index: {}]   ;;  %s1725_s6 = inlined_call_operand.vmem [shape: f32[32,1], index: 6, kind: input, shape index: {}]   ;;  %s1726_s5 = inlined_call_operand.vmem [shape: f32[32,16], index: 5, kind: input, shape index: {}]   ;;  %s1727_s8 = inlined_call_operand.vmem [shape: f32[64,32], index: 8, kind: input, shape index: {}]   ;;  %s1728_s7 = inlined_call_operand.vmem [shape: f32[1,32], index: 7, kind: input, shape index: {}]   ;;  %s1729_s9 = inlined_call_operand.vmem [shape: f32[64,16], index: 9, kind: output, shape index: {}]  }
   0x1   :  { %v121_v0 = vld [vmem:[%s1720_s3 + $0x18] sm:$0xff]  ;;  %v120_v1 = vld [vmem:[%s1720_s3 + $0x10] sm:$0xff]  ;;  %v119_v2 = vld [vmem:[%s1720_s3 + $0x8] sm:$0xff]  ;;  %1134 = vset.pattern.permute.xlu0 %v1201_v11  ;;  %1135 = vset.pattern.permute.xlu1 %v1201_v11 }
   0x2   :  { %134 = vmatpush.msra.mxu1 %v121_v0  ;;  %v118_v3 = vld [vmem:[%s1720_s3] sm:$0xff]  ;;  %v41_v5 = vld [vmem:[%s1721_s0 + $0x8] sm:$0xff]  ;;  %v42_v6 = vld [vmem:[%s1721_s0 + $0x10] sm:$0xff]  ;;  %1136 = vset.pattern.permute.xlu2 %v1201_v11 }
   0x3   :  { %v40_v4 = vld [vmem:[%s1721_s0] sm:$0xff]  ;;  %v1279_v7 = vld [vmem:[%s1721_s0 + $0x38] sm:$0xff]  ;;  %v1286_v8 = vld [vmem:[%s1721_s0 + $0x30] sm:$0xff] }
   0x4   :  { %135 = vmatpush.msra.mxu1 %v120_v1  ;;  %1071 = vmatpush.xpose.msk.msra.mxu2 %vm52_vm0, %v1279_v7  ;;  %v43_v9 = vld [vmem:[%s1721_s0 + $0x18] sm:$0xff]  ;;  %v1297_v10 = vld [vmem:[%s1721_s0 + $0x28] sm:$0xff]  ;;  %v44_v12 = vld [vmem:[%s1721_s0 + $0x20] sm:$0xff] }
   0x5   :  { %v163_v13 = vld [vmem:[%s1722_s4] sm:$0x1]  ;;  %v51_v18 = vld [vmem:[%s1723_s2 + $0x18] sm:$0xff]  ;;  %v50_v19 = vld [vmem:[%s1723_s2 + $0x10] sm:$0xff] }
   0x6   :  { %136 = vmatpush.msra.mxu1 %v119_v2  ;;  %89 = vmatpush.msra.mxu0 %v51_v18  ;;  %v49_v24 = vld [vmem:[%s1723_s2 + $0x8] sm:$0xff]  ;;  %v48_v25 = vld [vmem:[%s1723_s2] sm:$0xff]  ;;  %v1383_v50 = vld [vmem:[%s1724_s1 + $0x10] sm:$0xff] }
   0x7   :  { %v1341_v29 = vld [vmem:[%s1724_s1] sm:$0xff]  ;;  %v1360_v36 = vld [vmem:[%s1724_s1 + $0x8] sm:$0xff]  ;;  %vm1731_vm9 = vcmp.gt.f32.partialorder %v1383_v50, 0.0  ;;  %v1398_v58 = vld [vmem:[%s1724_s1 + $0x18] sm:$0xff] }
   0x8   :  { %137 = vmatpush.msra.mxu1 %v118_v3  ;;  %1072 = vmatpush.xpose.msk.msra.mxu2 %vm52_vm0, %v1286_v8  ;;  %vm260_vm2 = vcmp.gt.f32.partialorder %v1341_v29, 0.0  ;;  %v1355_v35 = vld [vmem:[%s1724_s1 + $0x20] sm:$0xff]  ;;  %vm261_vm5 = vcmp.gt.f32.partialorder %v1360_v36, 0.0  ;;  %vm263_vm11 = vcmp.gt.f32.partialorder %v1398_v58, 0.0  ;;  %v1412_v1 = vld [vmem:[%s1724_s1 + $0x28] sm:$0xff] }
   0x9   :  { %1063 = vmatmul.msk.f32.vlgmr.msra.gmra.mxu1 %vm52_vm0, %v40_v4  ;;  %90 = vmatpush.msra.mxu0 %v50_v19  ;;  %vm264_vm4 = vcmp.gt.f32.partialorder %v1355_v35, 0.0  ;;  %vm265_vm13 = vcmp.gt.f32.partialorder %v1412_v1, 0.0 }
   0xb   :  { %91 = vmatpush.msra.mxu0 %v49_v24 }
   0xc   :  { %1073 = vmatpush.xpose.msk.msra.mxu2 %vm52_vm0, %v1297_v10 }
   0xd   :  { %92 = vmatpush.msra.mxu0 %v48_v25 }
   0xe   :  { %1055 = vmatmul.msk.f32.vlgmr.msra.gmra.mxu0 %vm52_vm0, %v40_v4 }
  0x10   :  { %1074 = vmatpush.xpose.msk.msra.mxu2 %vm52_vm0, %v44_v12 }
  0x11   :  { %1064 = vmatmul.msk.f32.gmra.mxu1 %vm52_vm0, %v41_v5 }
  0x14   :  { %1075 = vmatpush.xpose.msk.msra.mxu2 %vm52_vm0, %v43_v9 }
  0x16   :  { %1056 = vmatmul.msk.f32.gmra.mxu0 %vm52_vm0, %v41_v5 }
  0x18   :  { %1076 = vmatpush.xpose.msk.msra.mxu2 %vm52_vm0, %v42_v6 }
  0x19   :  { %1065 = vmatmul.msk.f32.gmra.mxu1 %vm52_vm0, %v42_v6 }
  0x1c   :  { %1077 = vmatpush.xpose.msk.msra.mxu2 %vm52_vm0, %v41_v5 }
  0x1e   :  { %1057 = vmatmul.msk.f32.gmra.mxu0 %vm52_vm0, %v42_v6 }
  0x20   :  { %1078 = vmatpush.xpose.msk.msra.mxu2 %vm52_vm0, %v40_v4 }
  0x21   :  { %1066 = vmatmul.msk.f32.gmra.mxu1 %vm52_vm0, %v43_v9 }
  0x23   :  { %1079 = vmatmul.msk.f32.vlgmr.msra.gmra.mxu2 %vm52_vm0, %v163_v13 }
  0x26   :  { %1058 = vmatmul.msk.f32.gmra.mxu0 %vm52_vm0, %v43_v9 }
  0x29   :  { %1067 = vmatmul.msk.f32.gmra.mxu1 %vm52_vm0, %v44_v12 }
  0x2e   :  { %1059 = vmatmul.msk.f32.gmra.mxu0 %vm52_vm0, %v44_v12 }
  0x31   :  { %1068 = vmatmul.msk.f32.gmra.mxu1 %vm52_vm0, %v1297_v10 }
  0x36   :  { %1060 = vmatmul.msk.f32.gmra.mxu0 %vm52_vm0, %v1297_v10 }
  0x39   :  { %1069 = vmatmul.msk.f32.gmra.mxu1 %vm52_vm0, %v1286_v8 }
  0x3e   :  { %1061 = vmatmul.msk.f32.gmra.mxu0 %vm52_vm0, %v1286_v8 }
  0x41   :  { %1070 = vmatmul.msk.f32.gmra.mxu1 %vm52_vm0, %v1279_v7 }
  0x46   :  { %1062 = vmatmul.msk.f32.gmra.mxu0 %vm52_vm0, %v1279_v7  ;;  %v1426_v7 = vld [vmem:[%s1724_s1 + $0x30] sm:$0xff] }
  0x47   :  { %vm266_vm15 = vcmp.gt.f32.partialorder %v1426_v7, 0.0 }
  0x86   :  { %v139_v14 = vpop.f32.mrf.mxu1 }
  0x87   :  { %189 = vperm.xlu0 %1134, %v139_v14   ;;  %v1439_v14 = vld [vmem:[%s1724_s1 + $0x38] sm:$0xff] }
  0x8e   :  { %v142_v15 = vpop.f32.mrf.mxu1 }
  0x8f   :  { %194 = vperm.xlu0 %1134, %v142_v15  }
  0x96   :  { %v145_v16 = vpop.f32.mrf.mxu1 }
  0x97   :  { %199 = vperm.xlu1 %1135, %v145_v16  }
  0x9e   :  { %v148_v17 = vpop.f32.mrf.mxu1 }
  0x9f   :  { %204 = vperm.xlu1 %1135, %v148_v17  }
  0xa6   :  { %v151_v20 = vpop.f32.mrf.mxu1  ;;  %v184_v26 = vpop.f32.mrf.mxu2 }
  0xa7   :  { %209 = vperm.xlu2 %1136, %v151_v20   ;;  %v1336_v27 = vperm.slane %v184_v26, 0  ;;  %v94_v20 = vpop.f32.mrf.mxu0 }
  0xae   :  { %v154_v21 = vpop.f32.mrf.mxu1 }
  0xaf   :  { %214 = vperm.xlu2 %1136, %v154_v21   ;;  %v97_v21 = vpop.f32.mrf.mxu0 }
  0xb6   :  { %v157_v22 = vpop.f32.mrf.mxu1 }
  0xb7   :  { %219 = vperm.xlu1 %1135, %v157_v22   ;;  %v100_v22 = vpop.f32.mrf.mxu0 }
  0xbe   :  { %v160_v23 = vpop.f32.mrf.mxu1 }
  0xbf   :  { %224 = vperm.xlu1 %1135, %v160_v23   ;;  %v103_v23 = vpop.f32.mrf.mxu0 }
  0xf9   :  { %v190_v28 = vpop.permute.xlu0 %189 }
  0xfa   :  { %v228_v30 = vadd.f32 %v1336_v27, %v190_v28 }
  0xfc   :  { %v244_v31 = vmul.f32 0.2, %v228_v30  ;;  %vm236_vm1 = vcmp.gt.f32.partialorder %v228_v30, 0.0 }
  0xfe   :  { %v252_v32 = vsel %vm236_vm1, %v228_v30, %v244_v31 }
  0xff   :  { %v1348_v33 = vsel %vm260_vm2, %v252_v32, -9e+15 }
 0x100   :  { %v277_v34 = vsel %vm276_vm3, %v1348_v33, -inf }
 0x101   :  { %278 = vmax.xlane.f32.xlu0 %v277_v34  ;;  %v195_v37 = vpop.permute.xlu0 %194  ;;  %v210_v38 = vpop.permute.xlu2 %209 }
 0x102   :  { %v229_v39 = vadd.f32 %v1336_v27, %v195_v37  ;;  %v232_v40 = vadd.f32 %v1336_v27, %v210_v38 }
 0x104   :  { %v245_v41 = vmul.f32 0.2, %v229_v39  ;;  %v248_v42 = vmul.f32 0.2, %v232_v40  ;;  %vm240_vm6 = vcmp.gt.f32.partialorder %v232_v40, 0.0  ;;  %vm237_vm7 = vcmp.gt.f32.partialorder %v229_v39, 0.0 }
 0x106   :  { %v256_v43 = vsel %vm240_vm6, %v232_v40, %v248_v42  ;;  %v253_v44 = vsel %vm237_vm7, %v229_v39, %v245_v41  ;;  %vm1730_vm6 = vcmp.gt.f32.partialorder %v1439_v14, 0.0 }
 0x107   :  { %v1370_v45 = vsel %vm264_vm4, %v256_v43, -9e+15  ;;  %v1374_v46 = vsel %vm261_vm5, %v253_v44, -9e+15 }
 0x108   :  { %v289_v47 = vsel %vm276_vm3, %v1370_v45, -inf  ;;  %v280_v48 = vsel %vm276_vm3, %v1374_v46, -inf }
 0x109   :  { %v200_v49 = vpop.permute.xlu1 %199  ;;  %290 = vmax.xlane.f32.xlu0 %v289_v47  ;;  %281 = vmax.xlane.f32.xlu2 %v280_v48  ;;  %v215_v54 = vpop.permute.xlu2 %214 }
 0x10a   :  { %v230_v51 = vadd.f32 %v1336_v27, %v200_v49  ;;  %v233_v59 = vadd.f32 %v1336_v27, %v215_v54 }
 0x10c   :  { %v246_v52 = vmul.f32 0.2, %v230_v51  ;;  %vm238_vm8 = vcmp.gt.f32.partialorder %v230_v51, 0.0  ;;  %v249_v62 = vmul.f32 0.2, %v233_v59  ;;  %vm241_vm12 = vcmp.gt.f32.partialorder %v233_v59, 0.0 }
 0x10e   :  { %v254_v53 = vsel %vm238_vm8, %v230_v51, %v246_v52  ;;  %v257_v3 = vsel %vm241_vm12, %v233_v59, %v249_v62 }
 0x10f   :  { %v1391_v55 = vsel %vm1731_vm9, %v254_v53, -9e+15  ;;  %v1419_v4 = vsel %vm265_vm13, %v257_v3, -9e+15 }
 0x110   :  { %v283_v56 = vsel %vm276_vm3, %v1391_v55, -inf  ;;  %v292_v5 = vsel %vm276_vm3, %v1419_v4, -inf }
 0x111   :  { %v205_v57 = vpop.permute.xlu1 %204  ;;  %284 = vmax.xlane.f32.xlu1 %v283_v56 }
 0x112   :  { %v231_v60 = vadd.f32 %v1336_v27, %v205_v57 }
 0x114   :  { %v247_v61 = vmul.f32 0.2, %v231_v60  ;;  %vm239_vm10 = vcmp.gt.f32.partialorder %v231_v60, 0.0 }
 0x116   :  { %v255_v63 = vsel %vm239_vm10, %v231_v60, %v247_v61 }
 0x117   :  { %v1407_v0 = vsel %vm263_vm11, %v255_v63, -9e+15 }
 0x118   :  { %v286_v2 = vsel %vm276_vm3, %v1407_v0, -inf }
 0x119   :  { %287 = vmax.xlane.f32.xlu2 %v286_v2 }
 0x121   :  { %293 = vmax.xlane.f32.xlu2 %v292_v5 }
 0x129   :  { %v220_v6 = vpop.permute.xlu1 %219 }
 0x12a   :  { %v234_v8 = vadd.f32 %v1336_v27, %v220_v6 }
 0x12c   :  { %v250_v9 = vmul.f32 0.2, %v234_v8  ;;  %vm242_vm14 = vcmp.gt.f32.partialorder %v234_v8, 0.0 }
 0x12e   :  { %v258_v10 = vsel %vm242_vm14, %v234_v8, %v250_v9 }
 0x12f   :  { %v1432_v11 = vsel %vm266_vm15, %v258_v10, -9e+15 }
 0x130   :  { %v295_v12 = vsel %vm276_vm3, %v1432_v11, -inf }
 0x131   :  { %296 = vmax.xlane.f32.xlu0 %v295_v12  ;;  %v225_v13 = vpop.permute.xlu1 %224 }
 0x132   :  { %v235_v15 = vadd.f32 %v1336_v27, %v225_v13  ;;  %v106_v27 = vpop.f32.mrf.mxu0 }
 0x134   :  { %v251_v16 = vmul.f32 0.2, %v235_v15  ;;  %vm243_vm1 = vcmp.gt.f32.partialorder %v235_v15, 0.0 }
 0x136   :  { %v259_v17 = vsel %vm243_vm1, %v235_v15, %v251_v16 }
 0x137   :  { %v1445_v18 = vsel %vm1730_vm6, %v259_v17, -9e+15 }
 0x138   :  { %v298_v19 = vsel %vm276_vm3, %v1445_v18, -inf }
 0x139   :  { %299 = vmax.xlane.f32.xlu0 %v298_v19 }
 0x13a   :  { %v109_v39 = vpop.f32.mrf.mxu0 }
 0x174   :  { %v279_v24 = vpop.xlane.xlu0 %278 }
 0x175   :  { %v301_v25 = vsub.f32 %v1348_v33, %v279_v24 }
 0x177   :  { %v309_v26 = vmul.f32 1.442695, %v301_v25 }
 0x179   :  { %1137 = vpow2.f32 %v309_v26 }
 0x17c   :  { %v282_v28 = vpop.xlane.xlu2 %281  ;;  %v291_v30 = vpop.xlane.xlu0 %290 }
 0x17d   :  { %v302_v31 = vsub.f32 %v1374_v46, %v282_v28  ;;  %v305_v37 = vsub.f32 %v1370_v45, %v291_v30  ;;  %v112_v45 = vpop.f32.mrf.mxu0 }
 0x17f   :  { %v1451_v32 = vpop.eup %1137  ;;  %v311_v34 = vmul.f32 1.442695, %v302_v31  ;;  %v317_v40 = vmul.f32 1.442695, %v305_v37 }
 0x180   :  { %v325_v38 = vsel %vm276_vm3, %v1451_v32, 0.0 }
 0x181   :  { %326 = vadd.xlane.f32.xlu2 %v325_v38  ;;  %1139 = vpow2.f32 %v311_v34 }
 0x182   :  { %1141 = vpow2.f32 %v317_v40 }
 0x184   :  { %v285_v33 = vpop.xlane.xlu1 %284 }
 0x185   :  { %v303_v41 = vsub.f32 %v1391_v55, %v285_v33  ;;  %v115_v54 = vpop.f32.mrf.mxu0 }
 0x186   :  { %501 = vmatpush.msra.mxu3 %v115_v54 }
 0x187   :  { %v313_v42 = vmul.f32 1.442695, %v303_v41  ;;  %v1457_v43 = vpop.eup %1139 }
 0x188   :  { %v328_v44 = vsel %vm276_vm3, %v1457_v43, 0.0  ;;  %v1462_v48 = vpop.eup %1141  ;;  %502 = vmatpush.msra.mxu3 %v112_v45 }
 0x189   :  { %1143 = vpow2.f32 %v313_v42  ;;  %329 = vadd.xlane.f32.xlu1 %v328_v44  ;;  %v337_v53 = vsel %vm276_vm3, %v1462_v48, 0.0 }
 0x18a   :  { %503 = vmatpush.msra.mxu3 %v109_v39 }
 0x18c   :  { %v288_v46 = vpop.xlane.xlu2 %287  ;;  %504 = vmatpush.msra.mxu3 %v106_v27 }
 0x18d   :  { %v304_v47 = vsub.f32 %v1407_v0, %v288_v46 }
 0x18e   :  { %505 = vmatpush.msra.mxu3 %v103_v23 }
 0x18f   :  { %v1464_v49 = vpop.eup %1143  ;;  %v315_v51 = vmul.f32 1.442695, %v304_v47 }
 0x190   :  { %v331_v52 = vsel %vm276_vm3, %v1464_v49, 0.0  ;;  %506 = vmatpush.msra.mxu3 %v100_v22 }
 0x191   :  { %1145 = vpow2.f32 %v315_v51  ;;  %332 = vadd.xlane.f32.xlu2 %v331_v52  ;;  %338 = vadd.xlane.f32.xlu1 %v337_v53 }
 0x192   :  { %507 = vmatpush.msra.mxu3 %v97_v21 }
 0x194   :  { %v294_v55 = vpop.xlane.xlu2 %293  ;;  %508 = vmatpush.msra.mxu3 %v94_v20 }
 0x195   :  { %v306_v56 = vsub.f32 %v1419_v4, %v294_v55 }
 0x197   :  { %v1471_v57 = vpop.eup %1145  ;;  %v319_v59 = vmul.f32 1.442695, %v306_v56 }
 0x198   :  { %v334_v60 = vsel %vm276_vm3, %v1471_v57, 0.0 }
 0x199   :  { %1147 = vpow2.f32 %v319_v59  ;;  %335 = vadd.xlane.f32.xlu0 %v334_v60 }
 0x19f   :  { %v1475_v61 = vpop.eup %1147 }
 0x1a0   :  { %v340_v62 = vsel %vm276_vm3, %v1475_v61, 0.0 }
 0x1a1   :  { %341 = vadd.xlane.f32.xlu2 %v340_v62 }
 0x1a4   :  { %v297_v63 = vpop.xlane.xlu0 %296 }
 0x1a5   :  { %v307_v0 = vsub.f32 %v1432_v11, %v297_v63 }
 0x1a7   :  { %v321_v2 = vmul.f32 1.442695, %v307_v0 }
 0x1a9   :  { %1149 = vpow2.f32 %v321_v2 }
 0x1ac   :  { %v300_v3 = vpop.xlane.xlu0 %299 }
 0x1ad   :  { %v308_v4 = vsub.f32 %v1445_v18, %v300_v3 }
 0x1af   :  { %v1481_v5 = vpop.eup %1149  ;;  %v323_v6 = vmul.f32 1.442695, %v308_v4 }
 0x1b0   :  { %v343_v8 = vsel %vm276_vm3, %v1481_v5, 0.0 }
 0x1b1   :  { %1151 = vpow2.f32 %v323_v6  ;;  %344 = vadd.xlane.f32.xlu0 %v343_v8 }
 0x1b7   :  { %v1485_v9 = vpop.eup %1151 }
 0x1b8   :  { %v346_v10 = vsel %vm276_vm3, %v1485_v9, 0.0 }
 0x1b9   :  { %347 = vadd.xlane.f32.xlu1 %v346_v10 }
 0x1f4   :  { %v327_v11 = vpop.xlane.xlu2 %326 }
 0x1f5   :  { %1153 = vrcp.f32 %v327_v11  ;;  %v360_v18 = vand.u32 2147483648, %v327_v11  ;;  %v358_v19 = vand.u32 2147483647, %v327_v11  ;;  %vm354_vm8 = vweird.f32 %v327_v11 }
 0x1f7   :  { %v361_v22 = vor.u32 1.1754944e-38, %v360_v18  ;;  %vm359_vm12 = vcmp.eq.f32.partialorder %v358_v19, 8.507059e+37 }
 0x1fb   :  { %v1154_v12 = vpop.eup %1153 }
 0x1fc   :  { %v350_v13 = vmul.f32 %v1154_v12, %v327_v11  ;;  %v330_v15 = vpop.xlane.xlu1 %329  ;;  %vm355_vm7 = vweird.f32 %v1154_v12 }
 0x1fd   :  { %1155 = vrcp.f32 %v330_v15  ;;  %vm356_vm10 = vmor %vm354_vm8, %vm355_vm7  ;;  %v374_v34 = vand.u32 2147483648, %v330_v15  ;;  %v372_v37 = vand.u32 2147483647, %v330_v15  ;;  %vm368_vm1 = vweird.f32 %v330_v15 }
 0x1fe   :  { %v351_v16 = vsub.f32 1.0, %v350_v13 }
 0x1ff   :  { %v375_v41 = vor.u32 1.1754944e-38, %v374_v34  ;;  %vm373_vm8 = vcmp.eq.f32.partialorder %v372_v37, 8.507059e+37 }
 0x200   :  { %v352_v17 = vmul.f32 %v1154_v12, %v351_v16 }
 0x202   :  { %v353_v20 = vadd.f32 %v1154_v12, %v352_v17 }
 0x203   :  { %v1156_v21 = vpop.eup %1155 }
 0x204   :  { %v333_v23 = vpop.xlane.xlu2 %332  ;;  %v357_v24 = vsel %vm356_vm10, %v1154_v12, %v353_v20  ;;  %v364_v25 = vmul.f32 %v1156_v21, %v330_v15  ;;  %v1489_v26 = vpop.xlane.xlu1 %338  ;;  %vm369_vm14 = vweird.f32 %v1156_v21 }
 0x205   :  { %1157 = vrcp.f32 %v333_v23  ;;  %v362_v27 = vsel %vm359_vm12, %v361_v22, %v357_v24  ;;  %vm370_vm7 = vmor %vm368_vm1, %vm369_vm14  ;;  %v388_v45 = vand.u32 2147483648, %v333_v23  ;;  %v386_v52 = vand.u32 2147483647, %v333_v23  ;;  %v1529_v24 = vld [vmem:[%s1725_s6 + $0x10] sm:$0xff] }
 0x206   :  { %v365_v28 = vsub.f32 1.0, %v364_v25  ;;  %v461_v30 = vmul.f32 %v1451_v32, %v362_v27  ;;  %1159 = vrcp.f32 %v1489_v26  ;;  %vm382_vm12 = vweird.f32 %v333_v23  ;;  %v560_v27 = vld [vmem:[%s1726_s5 + $0x10] sm:$0xff] }
 0x207   :  { %v389_v56 = vor.u32 1.1754944e-38, %v388_v45  ;;  %vm387_vm1 = vcmp.eq.f32.partialorder %v386_v52, 8.507059e+37  ;;  %v416_v19 = vand.u32 2147483648, %v1489_v26  ;;  %v414_v20 = vand.u32 2147483647, %v1489_v26 }
 0x208   :  { %v366_v31 = vmul.f32 %v1156_v21, %v365_v28  ;;  %1080 = vmatmul.msk.f32.vlgmr.msra.gmra.mxu3 %vm276_vm3, %v461_v30  ;;  %v628_v30 = vld [vmem:[%s1725_s6 + $0x8] sm:$0xff] }
 0x209   :  { %v417_v25 = vor.u32 1.1754944e-38, %v416_v19  ;;  %v544_v19 = vld [vmem:[%s1727_s8 + $0x10] sm:$0xff] }
 0x20a   :  { %v367_v39 = vadd.f32 %v1156_v21, %v366_v31 }
 0x20b   :  { %v1158_v38 = vpop.eup %1157 }
 0x20c   :  { %v378_v40 = vmul.f32 %v1158_v38, %v333_v23  ;;  %v336_v33 = vpop.xlane.xlu0 %335  ;;  %v371_v44 = vsel %vm370_vm7, %v1156_v21, %v367_v39  ;;  %v1494_v32 = vpop.eup %1159  ;;  %vm383_vm10 = vweird.f32 %v1158_v38  ;;  %v1524_v23 = vld [vmem:[%s1725_s6 + $0x18] sm:$0xff] }
 0x20d   :  { %1161 = vrcp.f32 %v336_v33  ;;  %v376_v46 = vsel %vm373_vm8, %v375_v41, %v371_v44  ;;  %v406_v53 = vmul.f32 %v1494_v32, %v1489_v26  ;;  %vm384_vm14 = vmor %vm382_vm12, %vm383_vm10  ;;  %v402_v3 = vand.u32 2147483648, %v336_v33  ;;  %643 = vmatpush.msrb.mxu0 %v1524_v23 }
 0x20e   :  { %v379_v42 = vsub.f32 1.0, %v378_v40  ;;  %v462_v51 = vmul.f32 %v1457_v43, %v376_v46  ;;  %v400_v6 = vand.u32 2147483647, %v336_v33  ;;  %vm396_vm8 = vweird.f32 %v336_v33 }
 0x20f   :  { %v407_v63 = vsub.f32 1.0, %v406_v53  ;;  %v403_v12 = vor.u32 1.1754944e-38, %v402_v3  ;;  %644 = vmatpush.msrb.mxu0 %v1529_v24 }
 0x210   :  { %v380_v47 = vmul.f32 %v1158_v38, %v379_v42  ;;  %1081 = vmatmul.msk.f32.gmra.mxu3 %vm276_vm3, %v462_v51  ;;  %vm401_vm12 = vcmp.eq.f32.partialorder %v400_v6, 8.507059e+37 }
 0x211   :  { %v408_v8 = vmul.f32 %v1494_v32, %v407_v63  ;;  %645 = vmatpush.msrb.mxu0 %v628_v30 }
 0x212   :  { %v381_v54 = vadd.f32 %v1158_v38, %v380_v47 }
 0x213   :  { %v1162_v55 = vpop.eup %1161  ;;  %v409_v18 = vadd.f32 %v1494_v32, %v408_v8  ;;  %v558_v8 = vld [vmem:[%s1726_s5] sm:$0xff] }
 0x214   :  { %v392_v59 = vmul.f32 %v1162_v55, %v336_v33  ;;  %v1500_v60 = vpop.xlane.xlu2 %341  ;;  %v385_v62 = vsel %vm384_vm14, %v1158_v38, %v381_v54  ;;  %vm397_vm7 = vweird.f32 %v1162_v55  ;;  %vm411_vm14 = vweird.f32 %v1494_v32 }
 0x215   :  { %1163 = vrcp.f32 %v1500_v60  ;;  %v390_v43 = vsel %vm387_vm1, %v389_v56, %v385_v62  ;;  %vm398_vm10 = vmor %vm396_vm8, %vm397_vm7  ;;  %vm410_vm1 = vweird.f32 %v1489_v26  ;;  %v561_v26 = vld [vmem:[%s1726_s5 + $0x18] sm:$0xff]  ;;  %v430_v37 = vand.u32 2147483648, %v1500_v60 }
 0x216   :  { %v393_v0 = vsub.f32 1.0, %v392_v59  ;;  %v463_v2 = vmul.f32 %v1464_v49, %v390_v43  ;;  %vm1513_vm6 = vmor %vm410_vm1, %vm411_vm14  ;;  %598 = vmatpush.msrb.mxu2 %v561_v26  ;;  %vm424_vm8 = vweird.f32 %v1500_v60  ;;  %v428_v39 = vand.u32 2147483647, %v1500_v60  ;;  %v546_v26 = vld [vmem:[%s1727_s8 + $0x20] sm:$0xff] }
 0x217   :  { %v431_v41 = vor.u32 1.1754944e-38, %v430_v37 }
 0x218   :  { %v394_v4 = vmul.f32 %v1162_v55, %v393_v0  ;;  %1082 = vmatmul.msk.f32.gmra.mxu3 %vm276_vm3, %v463_v2  ;;  %599 = vmatpush.msrb.mxu2 %v560_v27 }
 0x21a   :  { %v395_v10 = vadd.f32 %v1162_v55, %v394_v4 }
 0x21b   :  { %v1164_v11 = vpop.eup %1163 }
 0x21c   :  { %v420_v13 = vmul.f32 %v1164_v11, %v1500_v60  ;;  %v399_v15 = vsel %vm398_vm10, %v1162_v55, %v395_v10  ;;  %vm425_vm7 = vweird.f32 %v1164_v11  ;;  %v627_v10 = vld [vmem:[%s1725_s6] sm:$0xff] }
 0x21d   :  { %v404_v16 = vsel %vm401_vm12, %v403_v12, %v399_v15  ;;  %vm426_vm10 = vmor %vm424_vm8, %vm425_vm7  ;;  %vm429_vm12 = vcmp.eq.f32.partialorder %v428_v39, 8.507059e+37  ;;  %646 = vmatpush.msrb.mxu0 %v627_v10  ;;  %v548_v39 = vld [vmem:[%s1727_s8 + $0x30] sm:$0xff] }
 0x21e   :  { %v421_v17 = vsub.f32 1.0, %v420_v13  ;;  %v464_v49 = vmul.f32 %v1471_v57, %v404_v16  ;;  %v413_v57 = vsel %vm1513_vm6, %v1494_v32, %v409_v18  ;;  %vm415_vm6 = vcmp.eq.f32.partialorder %v414_v20, 8.507059e+37  ;;  %v543_v16 = vld [vmem:[%s1727_s8 + $0x8] sm:$0xff] }
 0x21f   :  { %v418_v31 = vsel %vm415_vm6, %v417_v25, %v413_v57  ;;  %v545_v57 = vld [vmem:[%s1727_s8 + $0x18] sm:$0xff] }
 0x220   :  { %v422_v22 = vmul.f32 %v1164_v11, %v421_v17  ;;  %1083 = vmatmul.msk.f32.gmra.mxu3 %vm276_vm3, %v464_v49  ;;  %v465_v38 = vmul.f32 %v1462_v48, %v418_v31  ;;  %v547_v31 = vld [vmem:[%s1727_s8 + $0x28] sm:$0xff] }
 0x222   :  { %v423_v34 = vadd.f32 %v1164_v11, %v422_v22 }
 0x224   :  { %v345_v28 = vpop.xlane.xlu0 %344  ;;  %v427_v40 = vsel %vm426_vm10, %v1164_v11, %v423_v34  ;;  %v542_v11 = vld [vmem:[%s1727_s8] sm:$0xff] }
 0x225   :  { %1165 = vrcp.f32 %v345_v28  ;;  %v432_v32 = vsel %vm429_vm12, %v431_v41, %v427_v40  ;;  %v444_v46 = vand.u32 2147483648, %v345_v28  ;;  %v442_v48 = vand.u32 2147483647, %v345_v28 }
 0x226   :  { %v466_v51 = vmul.f32 %v1475_v61, %v432_v32  ;;  %vm438_vm1 = vweird.f32 %v345_v28 }
 0x227   :  { %v445_v54 = vor.u32 1.1754944e-38, %v444_v46  ;;  %vm443_vm7 = vcmp.eq.f32.partialorder %v442_v48, 8.507059e+37 }
 0x228   :  { %1084 = vmatmul.msk.f32.gmra.mxu3 %vm276_vm3, %v465_v38 }
 0x22b   :  { %v1166_v33 = vpop.eup %1165 }
 0x22c   :  { %v434_v42 = vmul.f32 %v1166_v33, %v345_v28  ;;  %v348_v44 = vpop.xlane.xlu1 %347  ;;  %vm439_vm14 = vweird.f32 %v1166_v33 }
 0x22d   :  { %1167 = vrcp.f32 %v348_v44  ;;  %vm440_vm6 = vmor %vm438_vm1, %vm439_vm14  ;;  %v458_v43 = vand.u32 2147483648, %v348_v44  ;;  %v456_v61 = vand.u32 2147483647, %v348_v44  ;;  %vm452_vm10 = vweird.f32 %v348_v44 }
 0x22e   :  { %v435_v45 = vsub.f32 1.0, %v434_v42  ;;  %v549_v42 = vld [vmem:[%s1727_s8 + $0x38] sm:$0xff]  ;;  %vm1734_vm1 = vcmp.gt.f32.partialorder %v1383_v50, 0.0 }
 0x22f   :  { %v459_v2 = vor.u32 1.1754944e-38, %v458_v43  ;;  %vm457_vm9 = vcmp.eq.f32.partialorder %v456_v61, 8.507059e+37 }
 0x230   :  { %v436_v47 = vmul.f32 %v1166_v33, %v435_v45  ;;  %1085 = vmatmul.msk.f32.gmra.mxu3 %vm276_vm3, %v466_v51  ;;  %v672_v45 = vld [vmem:[%s1728_s7] sm:$0x1] }
 0x232   :  { %v437_v52 = vadd.f32 %v1166_v33, %v436_v47 }
 0x233   :  { %v1168_v53 = vpop.eup %1167 }
 0x234   :  { %v448_v55 = vmul.f32 %v1168_v53, %v348_v44  ;;  %v441_v56 = vsel %vm440_vm6, %v1166_v33, %v437_v52  ;;  %vm453_vm8 = vweird.f32 %v1168_v53 }
 0x235   :  { %v446_v59 = vsel %vm443_vm7, %v445_v54, %v441_v56  ;;  %vm454_vm12 = vmor %vm452_vm10, %vm453_vm8 }
 0x236   :  { %v449_v60 = vsub.f32 1.0, %v448_v55  ;;  %v467_v62 = vmul.f32 %v1481_v5, %v446_v59  ;;  %v559_v5 = vld [vmem:[%s1726_s5 + $0x8] sm:$0xff] }
 0x237   :  { %600 = vmatpush.msrb.mxu2 %v559_v5 }
 0x238   :  { %v450_v63 = vmul.f32 %v1168_v53, %v449_v60  ;;  %1086 = vmatmul.msk.f32.gmra.mxu3 %vm276_vm3, %v467_v62 }
 0x239   :  { %601 = vmatpush.msrb.mxu2 %v558_v8 }
 0x23a   :  { %v451_v0 = vadd.f32 %v1168_v53, %v450_v63 }
 0x23b   :  { %1121 = vmatpush.msra.mxu2 %v1524_v23 }
 0x23c   :  { %v455_v3 = vsel %vm454_vm12, %v1168_v53, %v451_v0 }
 0x23d   :  { %v460_v4 = vsel %vm457_vm9, %v459_v2, %v455_v3  ;;  %1122 = vmatpush.msra.mxu2 %v1529_v24 }
 0x23e   :  { %v468_v6 = vmul.f32 %v1485_v9, %v460_v4 }
 0x23f   :  { %1123 = vmatpush.msra.mxu2 %v628_v30 }
 0x240   :  { %1087 = vmatmul.msk.f32.gmra.mxu3 %vm276_vm3, %v468_v6 }
 0x241   :  { %1124 = vmatpush.msra.mxu2 %v627_v10 }
 0x28b   :  { %v510_v9 = vpop.f32.mrf.mxu3 }
 0x28c   :  { %v534_v12 = vmax.f32 %v510_v9, 0.0 }
 0x28e   :  { %v550_v13 = vmul.f32 %v542_v11, %v534_v12 }
 0x290   :  { %1088 = vmatmul.msk.f32.vlgmr.msrb.gmra.mxu2 %vm52_vm0, %v550_v13  ;;  %1096 = vmatmul.msk.f32.vlgmr.msrb.gmra.mxu0 %vm52_vm0, %v550_v13 }
 0x293   :  { %v513_v15 = vpop.f32.mrf.mxu3 }
 0x294   :  { %v535_v17 = vmax.f32 %v513_v15, 0.0 }
 0x296   :  { %v551_v49 = vmul.f32 %v543_v16, %v535_v17 }
 0x298   :  { %1089 = vmatmul.msk.f32.gmra.mxu2 %vm52_vm0, %v551_v49  ;;  %1097 = vmatmul.msk.f32.gmra.mxu0 %vm52_vm0, %v551_v49 }
 0x29b   :  { %v516_v18 = vpop.f32.mrf.mxu3 }
 0x29c   :  { %v536_v20 = vmax.f32 %v516_v18, 0.0 }
 0x29e   :  { %v552_v21 = vmul.f32 %v544_v19, %v536_v20 }
 0x2a0   :  { %1090 = vmatmul.msk.f32.gmra.mxu2 %vm52_vm0, %v552_v21  ;;  %1098 = vmatmul.msk.f32.gmra.mxu0 %vm52_vm0, %v552_v21 }
 0x2a3   :  { %v519_v22 = vpop.f32.mrf.mxu3 }
 0x2a4   :  { %v537_v23 = vmax.f32 %v519_v22, 0.0 }
 0x2a6   :  { %v553_v24 = vmul.f32 %v545_v57, %v537_v23 }
 0x2a8   :  { %1091 = vmatmul.msk.f32.gmra.mxu2 %vm52_vm0, %v553_v24  ;;  %1099 = vmatmul.msk.f32.gmra.mxu0 %vm52_vm0, %v553_v24 }
 0x2ab   :  { %v522_v25 = vpop.f32.mrf.mxu3 }
 0x2ac   :  { %v538_v27 = vmax.f32 %v522_v25, 0.0 }
 0x2ae   :  { %v554_v28 = vmul.f32 %v546_v26, %v538_v27 }
 0x2b0   :  { %1092 = vmatmul.msk.f32.gmra.mxu2 %vm52_vm0, %v554_v28  ;;  %1100 = vmatmul.msk.f32.gmra.mxu0 %vm52_vm0, %v554_v28 }
 0x2b3   :  { %v525_v30 = vpop.f32.mrf.mxu3 }
 0x2b4   :  { %v539_v34 = vmax.f32 %v525_v30, 0.0 }
 0x2b6   :  { %v555_v37 = vmul.f32 %v547_v31, %v539_v34 }
 0x2b8   :  { %1093 = vmatmul.msk.f32.gmra.mxu2 %vm52_vm0, %v555_v37  ;;  %1101 = vmatmul.msk.f32.gmra.mxu0 %vm52_vm0, %v555_v37 }
 0x2bb   :  { %v528_v38 = vpop.f32.mrf.mxu3 }
 0x2bc   :  { %v540_v40 = vmax.f32 %v528_v38, 0.0 }
 0x2be   :  { %v556_v33 = vmul.f32 %v548_v39, %v540_v40 }
 0x2c0   :  { %1094 = vmatmul.msk.f32.gmra.mxu2 %vm52_vm0, %v556_v33 }
 0x2c3   :  { %v531_v41 = vpop.f32.mrf.mxu3 }
 0x2c4   :  { %v541_v44 = vmax.f32 %v531_v41, 0.0 }
 0x2c6   :  { %v557_v32 = vmul.f32 %v549_v42, %v541_v44 }
 0x2c8   :  { %1095 = vmatmul.msk.f32.gmra.mxu2 %vm52_vm0, %v557_v32  ;;  %1104 = vmatpush.xpose.msk.msrb.mxu1 %vm52_vm0, %v557_v32 }
 0x2cc   :  { %1105 = vmatpush.xpose.msk.msrb.mxu1 %vm52_vm0, %v556_v33 }
 0x2d0   :  { %1102 = vmatmul.msk.f32.vlgmr.msra.gmra.mxu2 %vm52_vm0, %v556_v33  ;;  %1106 = vmatpush.xpose.msk.msrb.mxu1 %vm52_vm0, %v555_v37 }
 0x2d4   :  { %1107 = vmatpush.xpose.msk.msrb.mxu1 %vm52_vm0, %v554_v28 }
 0x2d8   :  { %1103 = vmatmul.msk.f32.gmra.mxu2 %vm52_vm0, %v557_v32  ;;  %1108 = vmatpush.xpose.msk.msrb.mxu1 %vm52_vm0, %v553_v24 }
 0x2dc   :  { %1109 = vmatpush.xpose.msk.msrb.mxu1 %vm52_vm0, %v552_v21 }
 0x2e0   :  { %1110 = vmatpush.xpose.msk.msrb.mxu1 %vm52_vm0, %v551_v49 }
 0x2e4   :  { %1111 = vmatpush.xpose.msk.msrb.mxu1 %vm52_vm0, %v550_v13 }
 0x2e7   :  { %1112 = vmatmul.msk.f32.vlgmr.msrb.gmra.mxu1 %vm52_vm0, %v672_v45 }
 0x30d   :  { %v648_v46 = vpop.f32.mrf.mxu0 }
 0x30e   :  { %698 = vperm.xlu0 %1134, %v648_v46  }
 0x313   :  { %v603_v47 = vpop.f32.mrf.mxu2 }
 0x315   :  { %v651_v51 = vpop.f32.mrf.mxu0 }
 0x31b   :  { %v606_v48 = vpop.f32.mrf.mxu2 }
 0x31d   :  { %v654_v52 = vpop.f32.mrf.mxu0 }
 0x323   :  { %v609_v53 = vpop.f32.mrf.mxu2 }
 0x325   :  { %v657_v54 = vpop.f32.mrf.mxu0 }
 0x326   :  { %713 = vperm.xlu2 %1136, %v657_v54  }
 0x32b   :  { %v612_v55 = vpop.f32.mrf.mxu2 }
 0x32d   :  { %v660_v56 = vpop.f32.mrf.mxu0 }
 0x32e   :  { %718 = vperm.xlu0 %1134, %v660_v56  }
 0x333   :  { %v615_v59 = vpop.f32.mrf.mxu2 }
 0x335   :  { %v663_v60 = vpop.f32.mrf.mxu0 }
 0x336   :  { %723 = vperm.xlu1 %1135, %v663_v60  }
 0x33b   :  { %v618_v62 = vpop.f32.mrf.mxu2 }
 0x33e   :  { %703 = vperm.xlu1 %1135, %v651_v51  }
 0x343   :  { %v621_v43 = vpop.f32.mrf.mxu2 }
 0x34b   :  { %v624_v63 = vpop.f32.mrf.mxu2 }
 0x34c   :  { %1001 = vmatpush.msra.mxu1 %v624_v63  ;;  %1125 = vmatpush.msrb.mxu3 %v624_v63 }
 0x34e   :  { %1002 = vmatpush.msra.mxu1 %v621_v43  ;;  %1126 = vmatpush.msrb.mxu3 %v621_v43 }
 0x350   :  { %1003 = vmatpush.msra.mxu1 %v618_v62  ;;  %1127 = vmatpush.msrb.mxu3 %v618_v62 }
 0x352   :  { %1004 = vmatpush.msra.mxu1 %v615_v59  ;;  %1128 = vmatpush.msrb.mxu3 %v615_v59 }
 0x353   :  { %v666_v61 = vpop.f32.mrf.mxu2 }
 0x354   :  { %1005 = vmatpush.msra.mxu1 %v612_v55  ;;  %1129 = vmatpush.msrb.mxu3 %v612_v55 }
 0x355   :  { %728 = vperm.xlu2 %1136, %v666_v61  }
 0x356   :  { %1006 = vmatpush.msra.mxu1 %v609_v53  ;;  %1130 = vmatpush.msrb.mxu3 %v609_v53 }
 0x358   :  { %1007 = vmatpush.msra.mxu1 %v606_v48  ;;  %1131 = vmatpush.msrb.mxu3 %v606_v48 }
 0x35a   :  { %1008 = vmatpush.msra.mxu1 %v603_v47  ;;  %1132 = vmatpush.msrb.mxu3 %v603_v47 }
 0x35b   :  { %v669_v0 = vpop.f32.mrf.mxu2 }
 0x35c   :  { %733 = vperm.xlu0 %1134, %v669_v0  }
 0x35d   :  { %708 = vperm.xlu2 %1136, %v654_v52  }
 0x364   :  { %v693_v2 = vpop.f32.mrf.mxu1 }
 0x365   :  { %v736_v3 = vperm.slane %v693_v2, 0 }
 0x380   :  { %v699_v4 = vpop.permute.xlu0 %698  ;;  %v714_v6 = vpop.permute.xlu2 %713 }
 0x381   :  { %v737_v5 = vadd.f32 %v736_v3, %v699_v4  ;;  %v740_v8 = vadd.f32 %v736_v3, %v714_v6 }
 0x383   :  { %v756_v10 = vmul.f32 0.2, %v740_v8  ;;  %vm748_vm0 = vcmp.gt.f32.partialorder %v740_v8, 0.0  ;;  %v753_v9 = vmul.f32 0.2, %v737_v5  ;;  %vm745_vm9 = vcmp.gt.f32.partialorder %v737_v5, 0.0 }
 0x385   :  { %v764_v11 = vsel %vm748_vm0, %v740_v8, %v756_v10  ;;  %v761_v15 = vsel %vm745_vm9, %v737_v5, %v753_v9 }
 0x386   :  { %v772_v12 = vsel %vm263_vm11, %v764_v11, -9e+15  ;;  %v769_v16 = vsel %vm260_vm2, %v761_v15, -9e+15 }
 0x387   :  { %v786_v13 = vsel %vm276_vm3, %v772_v12, -inf  ;;  %v777_v17 = vsel %vm276_vm3, %v769_v16, -inf }
 0x388   :  { %787 = vmax.xlane.f32.xlu1 %v786_v13 }
 0x390   :  { %778 = vmax.xlane.f32.xlu1 %v777_v17 }
 0x3a0   :  { %v719_v49 = vpop.permute.xlu0 %718 }
 0x3a1   :  { %v741_v18 = vadd.f32 %v736_v3, %v719_v49 }
 0x3a3   :  { %v757_v19 = vmul.f32 0.2, %v741_v18  ;;  %vm749_vm14 = vcmp.gt.f32.partialorder %v741_v18, 0.0 }
 0x3a5   :  { %v765_v20 = vsel %vm749_vm14, %v741_v18, %v757_v19 }
 0x3a6   :  { %v773_v58 = vsel %vm264_vm4, %v765_v20, -9e+15 }
 0x3a7   :  { %v789_v21 = vsel %vm276_vm3, %v773_v58, -inf }
 0x3a8   :  { %v724_v22 = vpop.permute.xlu1 %723  ;;  %790 = vmax.xlane.f32.xlu0 %v789_v21 }
 0x3a9   :  { %v742_v57 = vadd.f32 %v736_v3, %v724_v22 }
 0x3ab   :  { %v758_v23 = vmul.f32 0.2, %v742_v57  ;;  %vm750_vm11 = vcmp.gt.f32.partialorder %v742_v57, 0.0 }
 0x3ad   :  { %v766_v29 = vsel %vm750_vm11, %v742_v57, %v758_v23 }
 0x3ae   :  { %v774_v24 = vsel %vm265_vm13, %v766_v29, -9e+15 }
 0x3af   :  { %v729_v25 = vpop.permute.xlu2 %728  ;;  %v792_v26 = vsel %vm276_vm3, %v774_v24, -inf }
 0x3b0   :  { %v743_v27 = vadd.f32 %v736_v3, %v729_v25  ;;  %v704_v28 = vpop.permute.xlu1 %703  ;;  %793 = vmax.xlane.f32.xlu2 %v792_v26 }
 0x3b1   :  { %v738_v30 = vadd.f32 %v736_v3, %v704_v28 }
 0x3b2   :  { %v759_v35 = vmul.f32 0.2, %v743_v27  ;;  %vm751_vm2 = vcmp.gt.f32.partialorder %v743_v27, 0.0 }
 0x3b3   :  { %v754_v31 = vmul.f32 0.2, %v738_v30  ;;  %vm746_vm4 = vcmp.gt.f32.partialorder %v738_v30, 0.0 }
 0x3b4   :  { %v767_v34 = vsel %vm751_vm2, %v743_v27, %v759_v35 }
 0x3b5   :  { %v775_v37 = vsel %vm266_vm15, %v767_v34, -9e+15  ;;  %v762_v38 = vsel %vm746_vm4, %v738_v30, %v754_v31 }
 0x3b6   :  { %v795_v39 = vsel %vm276_vm3, %v775_v37, -inf  ;;  %v770_v1 = vsel %vm261_vm5, %v762_v38, -9e+15  ;;  %vm1735_vm5 = vcmp.gt.f32.partialorder %v1439_v14, 0.0 }
 0x3b7   :  { %v709_v40 = vpop.permute.xlu2 %708  ;;  %796 = vmax.xlane.f32.xlu0 %v795_v39  ;;  %v780_v33 = vsel %vm276_vm3, %v770_v1, -inf }
 0x3b8   :  { %v739_v41 = vadd.f32 %v736_v3, %v709_v40  ;;  %781 = vmax.xlane.f32.xlu2 %v780_v33 }
 0x3ba   :  { %v755_v42 = vmul.f32 0.2, %v739_v41  ;;  %vm747_vm13 = vcmp.gt.f32.partialorder %v739_v41, 0.0 }
 0x3bc   :  { %v763_v44 = vsel %vm747_vm13, %v739_v41, %v755_v42 }
 0x3bd   :  { %v771_v32 = vsel %vm1734_vm1, %v763_v44, -9e+15 }
 0x3be   :  { %v783_v7 = vsel %vm276_vm3, %v771_v32, -inf }
 0x3bf   :  { %784 = vmax.xlane.f32.xlu0 %v783_v7 }
 0x3ce   :  { %v734_v45 = vpop.permute.xlu0 %733 }
 0x3cf   :  { %v744_v46 = vadd.f32 %v736_v3, %v734_v45 }
 0x3d1   :  { %v760_v47 = vmul.f32 0.2, %v744_v46  ;;  %vm752_vm15 = vcmp.gt.f32.partialorder %v744_v46, 0.0 }
 0x3d3   :  { %v768_v36 = vsel %vm752_vm15, %v744_v46, %v760_v47 }
 0x3d4   :  { %v776_v51 = vsel %vm1735_vm5, %v768_v36, -9e+15 }
 0x3d5   :  { %v798_v48 = vsel %vm276_vm3, %v776_v51, -inf }
 0x3d6   :  { %799 = vmax.xlane.f32.xlu1 %v798_v48 }
 0x3fb   :  { %v788_v52 = vpop.xlane.xlu1 %787 }
 0x3fc   :  { %v804_v53 = vsub.f32 %v772_v12, %v788_v52 }
 0x3fe   :  { %v815_v54 = vmul.f32 1.442695, %v804_v53 }
 0x400   :  { %1169 = vpow2.f32 %v815_v54 }
 0x403   :  { %v779_v50 = vpop.xlane.xlu1 %778 }
 0x404   :  { %v801_v55 = vsub.f32 %v769_v16, %v779_v50 }
 0x406   :  { %v1640_v56 = vpop.eup %1169  ;;  %v809_v59 = vmul.f32 1.442695, %v801_v55 }
 0x407   :  { %v834_v60 = vsel %vm276_vm3, %v1640_v56, 0.0 }
 0x408   :  { %1171 = vpow2.f32 %v809_v59  ;;  %835 = vadd.xlane.f32.xlu2 %v834_v60 }
 0x40e   :  { %v1644_v62 = vpop.eup %1171 }
 0x40f   :  { %v825_v14 = vsel %vm276_vm3, %v1644_v62, 0.0 }
 0x410   :  { %826 = vadd.xlane.f32.xlu2 %v825_v14 }
 0x41b   :  { %v791_v43 = vpop.xlane.xlu0 %790 }
 0x41c   :  { %v805_v63 = vsub.f32 %v773_v58, %v791_v43 }
 0x41e   :  { %v817_v61 = vmul.f32 1.442695, %v805_v63 }
 0x420   :  { %1173 = vpow2.f32 %v817_v61 }
 0x423   :  { %v794_v0 = vpop.xlane.xlu2 %793 }
 0x424   :  { %v806_v2 = vsub.f32 %v774_v24, %v794_v0 }
 0x426   :  { %v1648_v3 = vpop.eup %1173  ;;  %v819_v4 = vmul.f32 1.442695, %v806_v2 }
 0x427   :  { %v837_v6 = vsel %vm276_vm3, %v1648_v3, 0.0 }
 0x428   :  { %1175 = vpow2.f32 %v819_v4  ;;  %838 = vadd.xlane.f32.xlu1 %v837_v6 }
 0x42a   :  { %v797_v5 = vpop.xlane.xlu0 %796 }
 0x42b   :  { %v807_v8 = vsub.f32 %v775_v37, %v797_v5  ;;  %v782_v10 = vpop.xlane.xlu2 %781 }
 0x42c   :  { %v802_v9 = vsub.f32 %v770_v1, %v782_v10 }
 0x42d   :  { %v821_v11 = vmul.f32 1.442695, %v807_v8 }
 0x42e   :  { %v1652_v12 = vpop.eup %1175  ;;  %v811_v13 = vmul.f32 1.442695, %v802_v9 }
 0x42f   :  { %1177 = vpow2.f32 %v821_v11  ;;  %v840_v15 = vsel %vm276_vm3, %v1652_v12, 0.0 }
 0x430   :  { %1179 = vpow2.f32 %v811_v13  ;;  %841 = vadd.xlane.f32.xlu0 %v840_v15 }
 0x432   :  { %v785_v16 = vpop.xlane.xlu0 %784 }
 0x433   :  { %v803_v17 = vsub.f32 %v771_v32, %v785_v16 }
 0x435   :  { %v1656_v49 = vpop.eup %1177  ;;  %v813_v18 = vmul.f32 1.442695, %v803_v17 }
 0x436   :  { %v1658_v19 = vpop.eup %1179  ;;  %v843_v20 = vsel %vm276_vm3, %v1656_v49, 0.0 }
 0x437   :  { %1181 = vpow2.f32 %v813_v18  ;;  %844 = vadd.xlane.f32.xlu1 %v843_v20  ;;  %v828_v58 = vsel %vm276_vm3, %v1658_v19, 0.0 }
 0x438   :  { %829 = vadd.xlane.f32.xlu0 %v828_v58 }
 0x43d   :  { %v1664_v21 = vpop.eup %1181 }
 0x43e   :  { %v831_v22 = vsel %vm276_vm3, %v1664_v21, 0.0 }
 0x43f   :  { %832 = vadd.xlane.f32.xlu1 %v831_v22 }
 0x449   :  { %v800_v57 = vpop.xlane.xlu1 %799 }
 0x44a   :  { %v808_v23 = vsub.f32 %v776_v51, %v800_v57 }
 0x44c   :  { %v823_v29 = vmul.f32 1.442695, %v808_v23 }
 0x44e   :  { %1183 = vpow2.f32 %v823_v29 }
 0x454   :  { %v1668_v24 = vpop.eup %1183 }
 0x455   :  { %v846_v25 = vsel %vm276_vm3, %v1668_v24, 0.0 }
 0x456   :  { %847 = vadd.xlane.f32.xlu2 %v846_v25 }
 0x47b   :  { %v836_v26 = vpop.xlane.xlu2 %835 }
 0x47c   :  { %1185 = vrcp.f32 %v836_v26  ;;  %v902_v31 = vand.u32 2147483648, %v836_v26  ;;  %v900_v37 = vand.u32 2147483647, %v836_v26  ;;  %vm896_vm7 = vweird.f32 %v836_v26 }
 0x47e   :  { %v903_v1 = vor.u32 1.1754944e-38, %v902_v31  ;;  %vm901_vm10 = vcmp.eq.f32.partialorder %v900_v37, 8.507059e+37 }
 0x482   :  { %v1186_v27 = vpop.eup %1185 }
 0x483   :  { %v892_v28 = vmul.f32 %v1186_v27, %v836_v26  ;;  %v827_v30 = vpop.xlane.xlu2 %826  ;;  %vm897_vm6 = vweird.f32 %v1186_v27 }
 0x484   :  { %1187 = vrcp.f32 %v827_v30  ;;  %vm898_vm8 = vmor %vm896_vm7, %vm897_vm6  ;;  %v860_v32 = vand.u32 2147483648, %v827_v30  ;;  %v858_v45 = vand.u32 2147483647, %v827_v30  ;;  %vm854_vm0 = vweird.f32 %v827_v30 }
 0x485   :  { %v893_v35 = vsub.f32 1.0, %v892_v28 }
 0x486   :  { %v861_v47 = vor.u32 1.1754944e-38, %v860_v32  ;;  %vm859_vm14 = vcmp.eq.f32.partialorder %v858_v45, 8.507059e+37 }
 0x487   :  { %v894_v34 = vmul.f32 %v1186_v27, %v893_v35 }
 0x489   :  { %v895_v38 = vadd.f32 %v1186_v27, %v894_v34 }
 0x48a   :  { %v1188_v39 = vpop.eup %1187 }
 0x48b   :  { %v850_v40 = vmul.f32 %v1188_v39, %v827_v30  ;;  %v899_v33 = vsel %vm898_vm8, %v1186_v27, %v895_v38  ;;  %vm855_vm12 = vweird.f32 %v1188_v39 }
 0x48c   :  { %v904_v41 = vsel %vm901_vm10, %v903_v1, %v899_v33  ;;  %vm856_vm9 = vmor %vm854_vm0, %vm855_vm12 }
 0x48d   :  { %v851_v42 = vsub.f32 1.0, %v850_v40  ;;  %v964_v44 = vmul.f32 %v1640_v56, %v904_v41 }
 0x48f   :  { %v852_v7 = vmul.f32 %v1188_v39, %v851_v42  ;;  %1116 = vmatmul.msk.f32.vlgmr.msrb.gmra.mxu3 %vm276_vm3, %v964_v44 }
 0x491   :  { %v853_v46 = vadd.f32 %v1188_v39, %v852_v7 }
 0x493   :  { %v857_v36 = vsel %vm856_vm9, %v1188_v39, %v853_v46 }
 0x494   :  { %v862_v51 = vsel %vm859_vm14, %v861_v47, %v857_v36 }
 0x495   :  { %v961_v48 = vmul.f32 %v1644_v62, %v862_v51 }
 0x497   :  { %1113 = vmatmul.msk.f32.vlgmr.msra.gmra.mxu1 %vm276_vm3, %v961_v48 }
 0x49b   :  { %v839_v52 = vpop.xlane.xlu1 %838 }
 0x49c   :  { %1189 = vrcp.f32 %v839_v52  ;;  %v916_v59 = vand.u32 2147483648, %v839_v52  ;;  %v914_v14 = vand.u32 2147483647, %v839_v52  ;;  %vm910_vm2 = vweird.f32 %v839_v52 }
 0x49e   :  { %v917_v0 = vor.u32 1.1754944e-38, %v916_v59  ;;  %vm915_vm13 = vcmp.eq.f32.partialorder %v914_v14, 8.507059e+37 }
 0x4a2   :  { %v1190_v53 = vpop.eup %1189 }
 0x4a3   :  { %v906_v54 = vmul.f32 %v1190_v53, %v839_v52  ;;  %v842_v50 = vpop.xlane.xlu0 %841  ;;  %vm911_vm11 = vweird.f32 %v1190_v53 }
 0x4a4   :  { %1191 = vrcp.f32 %v842_v50  ;;  %vm912_vm4 = vmor %vm910_vm2, %vm911_vm11  ;;  %v930_v8 = vand.u32 2147483648, %v842_v50  ;;  %v928_v9 = vand.u32 2147483647, %v842_v50  ;;  %vm924_vm15 = vweird.f32 %v842_v50 }
 0x4a5   :  { %v907_v55 = vsub.f32 1.0, %v906_v54 }
 0x4a6   :  { %v931_v18 = vor.u32 1.1754944e-38, %v930_v8  ;;  %vm929_vm6 = vcmp.eq.f32.partialorder %v928_v9, 8.507059e+37 }
 0x4a7   :  { %v908_v56 = vmul.f32 %v1190_v53, %v907_v55 }
 0x4a9   :  { %v909_v60 = vadd.f32 %v1190_v53, %v908_v56 }
 0x4aa   :  { %v1192_v43 = vpop.eup %1191  ;;  %v845_v63 = vpop.xlane.xlu1 %844 }
 0x4ab   :  { %v920_v61 = vmul.f32 %v1192_v43, %v842_v50  ;;  %1193 = vrcp.f32 %v845_v63  ;;  %v830_v62 = vpop.xlane.xlu0 %829  ;;  %v913_v4 = vsel %vm912_vm4, %v1190_v53, %v909_v60  ;;  %vm925_vm1 = vweird.f32 %v1192_v43 }
 0x4ac   :  { %1195 = vrcp.f32 %v830_v62  ;;  %v918_v6 = vsel %vm915_vm13, %v917_v0, %v913_v4  ;;  %vm926_vm5 = vmor %vm924_vm15, %vm925_vm1  ;;  %v944_v57 = vand.u32 2147483648, %v845_v63  ;;  %v874_v25 = vand.u32 2147483648, %v830_v62 }
 0x4ad   :  { %v921_v2 = vsub.f32 1.0, %v920_v61  ;;  %v965_v10 = vmul.f32 %v1648_v3, %v918_v6  ;;  %v872_v28 = vand.u32 2147483647, %v830_v62  ;;  %v942_v30 = vand.u32 2147483647, %v845_v63 }
 0x4ae   :  { %vm938_vm10 = vweird.f32 %v845_v63  ;;  %vm868_vm12 = vweird.f32 %v830_v62  ;;  %v945_v37 = vor.u32 1.1754944e-38, %v944_v57  ;;  %v875_v38 = vor.u32 1.1754944e-38, %v874_v25 }
 0x4af   :  { %v922_v5 = vmul.f32 %v1192_v43, %v921_v2  ;;  %1117 = vmatmul.msk.f32.gmra.mxu3 %vm276_vm3, %v965_v10  ;;  %vm873_vm14 = vcmp.eq.f32.partialorder %v872_v28, 8.507059e+37  ;;  %vm943_vm11 = vcmp.eq.f32.partialorder %v942_v30, 8.507059e+37 }
 0x4b1   :  { %v1194_v11 = vpop.eup %1193  ;;  %v923_v13 = vadd.f32 %v1192_v43, %v922_v5 }
 0x4b2   :  { %v1196_v15 = vpop.eup %1195  ;;  %v934_v16 = vmul.f32 %v1194_v11, %v845_v63  ;;  %v833_v17 = vpop.xlane.xlu1 %832  ;;  %vm939_vm7 = vweird.f32 %v1194_v11 }
 0x4b3   :  { %v864_v20 = vmul.f32 %v1196_v15, %v830_v62  ;;  %1197 = vrcp.f32 %v833_v17  ;;  %v927_v22 = vsel %vm926_vm5, %v1192_v43, %v923_v13  ;;  %vm869_vm8 = vweird.f32 %v1196_v15  ;;  %vm940_vm0 = vmor %vm938_vm10, %vm939_vm7 }
 0x4b4   :  { %v935_v58 = vsub.f32 1.0, %v934_v16  ;;  %v932_v3 = vsel %vm929_vm6, %v931_v18, %v927_v22  ;;  %vm870_vm9 = vmor %vm868_vm12, %vm869_vm8  ;;  %v888_v42 = vand.u32 2147483648, %v833_v17  ;;  %v886_v7 = vand.u32 2147483647, %v833_v17 }
 0x4b5   :  { %v865_v23 = vsub.f32 1.0, %v864_v20  ;;  %v966_v26 = vmul.f32 %v1652_v12, %v932_v3  ;;  %vm882_vm4 = vweird.f32 %v833_v17  ;;  %vm1042_vm8 = vcmask 130048  }
 0x4b6   :  { %v936_v29 = vmul.f32 %v1194_v11, %v935_v58  ;;  %v889_v47 = vor.u32 1.1754944e-38, %v888_v42  ;;  %vm887_vm1 = vcmp.eq.f32.partialorder %v886_v7, 8.507059e+37 }
 0x4b7   :  { %v866_v27 = vmul.f32 %v1196_v15, %v865_v23  ;;  %1118 = vmatmul.msk.f32.gmra.mxu3 %vm276_vm3, %v966_v26 }
 0x4b8   :  { %v937_v35 = vadd.f32 %v1194_v11, %v936_v29 }
 0x4b9   :  { %v1198_v31 = vpop.eup %1197  ;;  %v867_v34 = vadd.f32 %v1196_v15, %v866_v27 }
 0x4ba   :  { %v878_v39 = vmul.f32 %v1198_v31, %v833_v17  ;;  %v941_v1 = vsel %vm940_vm0, %v1194_v11, %v937_v35  ;;  %vm883_vm2 = vweird.f32 %v1198_v31 }
 0x4bb   :  { %v871_v12 = vsel %vm870_vm9, %v1196_v15, %v867_v34  ;;  %v946_v41 = vsel %vm943_vm11, %v945_v37, %v941_v1  ;;  %vm884_vm13 = vmor %vm882_vm4, %vm883_vm2 }
 0x4bc   :  { %v879_v40 = vsub.f32 1.0, %v878_v39  ;;  %v876_v33 = vsel %vm873_vm14, %v875_v38, %v871_v12  ;;  %v967_v45 = vmul.f32 %v1656_v49, %v946_v41 }
 0x4bd   :  { %v962_v44 = vmul.f32 %v1658_v19, %v876_v33 }
 0x4be   :  { %v880_v32 = vmul.f32 %v1198_v31, %v879_v40 }
 0x4bf   :  { %1114 = vmatmul.msk.f32.gmra.mxu1 %vm276_vm3, %v962_v44  ;;  %1119 = vmatmul.msk.f32.gmra.mxu3 %vm276_vm3, %v967_v45 }
 0x4c0   :  { %v881_v46 = vadd.f32 %v1198_v31, %v880_v32 }
 0x4c2   :  { %v885_v36 = vsel %vm884_vm13, %v1198_v31, %v881_v46 }
 0x4c3   :  { %v890_v51 = vsel %vm887_vm1, %v889_v47, %v885_v36 }
 0x4c4   :  { %v963_v48 = vmul.f32 %v1664_v21, %v890_v51 }
 0x4c7   :  { %1115 = vmatmul.msk.f32.gmra.mxu1 %vm276_vm3, %v963_v48 }
 0x4c9   :  { %v848_v19 = vpop.xlane.xlu2 %847 }
 0x4ca   :  { %1199 = vrcp.f32 %v848_v19  ;;  %v958_v50 = vand.u32 2147483648, %v848_v19  ;;  %v956_v55 = vand.u32 2147483647, %v848_v19  ;;  %vm952_vm5 = vweird.f32 %v848_v19 }
 0x4cc   :  { %v959_v59 = vor.u32 1.1754944e-38, %v958_v50  ;;  %vm957_vm7 = vcmp.eq.f32.partialorder %v956_v55, 8.507059e+37 }
 0x4d0   :  { %v1200_v52 = vpop.eup %1199 }
 0x4d1   :  { %v948_v53 = vmul.f32 %v1200_v52, %v848_v19  ;;  %vm953_vm15 = vweird.f32 %v1200_v52 }
 0x4d2   :  { %vm954_vm6 = vmor %vm952_vm5, %vm953_vm15 }
 0x4d3   :  { %v949_v54 = vsub.f32 1.0, %v948_v53 }
 0x4d5   :  { %v950_v49 = vmul.f32 %v1200_v52, %v949_v54 }
 0x4d7   :  { %v951_v56 = vadd.f32 %v1200_v52, %v950_v49 }
 0x4d9   :  { %v955_v60 = vsel %vm954_vm6, %v1200_v52, %v951_v56 }
 0x4da   :  { %v960_v14 = vsel %vm957_vm7, %v959_v59, %v955_v60 }
 0x4db   :  { %v968_v21 = vmul.f32 %v1668_v24, %v960_v14 }
 0x4dd   :  { %1120 = vmatmul.msk.f32.gmra.mxu3 %vm276_vm3, %v968_v21 }
 0x512   :  { %v1019_v43 = vpop.f32.mrf.mxu3 }
 0x513   :  { %v1037_v63 = vmax.f32 %v1019_v43, 0.0 }
 0x514   :  { %v1010_v61 = vpop.f32.mrf.mxu1 }
 0x515   :  { %1046 = vst.msk [vmem:[%s1729_s9 + $0x18] sm:$0xff] %vm1042_vm8, %v1037_v63  ;;  %v1034_v62 = vmax.f32 %v1010_v61, 0.0 }
 0x517   :  { %1043 = vst.msk [vmem:[%s1729_s9] sm:$0xff] %vm1042_vm8, %v1034_v62 }
 0x532   :  { %v1022_v0 = vpop.f32.mrf.mxu3 }
 0x533   :  { %v1038_v2 = vmax.f32 %v1022_v0, 0.0 }
 0x535   :  { %1047 = vst.msk [vmem:[%s1729_s9 + $0x20] sm:$0xff] %vm1042_vm8, %v1038_v2 }
 0x53a   :  { %v1025_v24 = vpop.f32.mrf.mxu3 }
 0x53b   :  { %v1039_v6 = vmax.f32 %v1025_v24, 0.0 }
 0x53c   :  { %v1013_v4 = vpop.f32.mrf.mxu1 }
 0x53d   :  { %v1035_v5 = vmax.f32 %v1013_v4, 0.0  ;;  %1048 = vst.msk [vmem:[%s1729_s9 + $0x28] sm:$0xff] %vm1042_vm8, %v1039_v6 }
 0x53f   :  { %1044 = vst.msk [vmem:[%s1729_s9 + $0x8] sm:$0xff] %vm1042_vm8, %v1035_v5 }
 0x542   :  { %v1028_v8 = vpop.f32.mrf.mxu3 }
 0x543   :  { %v1040_v9 = vmax.f32 %v1028_v8, 0.0 }
 0x544   :  { %v1016_v10 = vpop.f32.mrf.mxu1 }
 0x545   :  { %v1036_v11 = vmax.f32 %v1016_v10, 0.0  ;;  %1049 = vst.msk [vmem:[%s1729_s9 + $0x30] sm:$0xff] %vm1042_vm8, %v1040_v9 }
 0x547   :  { %1045 = vst.msk [vmem:[%s1729_s9 + $0x10] sm:$0xff] %vm1042_vm8, %v1036_v11 }
 0x560   :  { %v1031_v13 = vpop.f32.mrf.mxu3 }
 0x561   :  { %v1041_v15 = vmax.f32 %v1031_v13, 0.0 }
 0x563   :  { %1050 = vst.msk [vmem:[%s1729_s9 + $0x38] sm:$0xff] %vm1042_vm8, %v1041_v15 }

</bundles_post_ra>
